<compile_context>
chip_gen: v7x
topology: tpu7x:2x2x1
jax: 0.10.0
libtpu: 0.0.40
codegen_flags: <defaults>
</compile_context>

<pallas_src>
import functools
import math

import jax
import jax.numpy as jnp
import numpy as np
from jax.experimental import pallas as pl
from jax.experimental.pallas import tpu as pltpu


def _layernorm(x, eps=1e-5):
    # nn.LayerNorm([D]) constructed fresh in forward() -> weight=1, bias=0
    mu = jnp.mean(x, axis=-1, keepdims=True)
    xc = x - mu
    var = jnp.mean(xc * xc, axis=-1, keepdims=True)
    return xc * jax.lax.rsqrt(var + eps)


def transformer_block_kernel(n_heads, head_dim, need_weights,
                             x_ref,
                             wq_ref, wk_ref, wv_ref,
                             bq_ref, bk_ref, bv_ref,
                             wo_ref, bo_ref,
                             w1_ref, b1_ref, w2_ref, b2_ref,
                             *out_refs):
    """One grid step: one batch element, all heads fused, entirely in VMEM."""
    f32 = jnp.float32
    bf16 = jnp.bfloat16

    if need_weights:
        out_ref, attw_ref = out_refs
    else:
        (out_ref,) = out_refs

    x = x_ref[0]                                      # (T, D) f32
    x_bf = x.astype(bf16)

    # --- Fused, lane-dense QKV projections: three (T,D)@(D,D) MXU matmuls -----
    # (1/sqrt(head_dim) is already folded into wq/bq on the host.)
    q = jnp.dot(x_bf, wq_ref[...], preferred_element_type=f32) + bq_ref[...]
    k = jnp.dot(x_bf, wk_ref[...], preferred_element_type=f32) + bk_ref[...]
    v = jnp.dot(x_bf, wv_ref[...], preferred_element_type=f32) + bv_ref[...]

    # --- Head split: one data relayout (static lane slices + stack), no matmuls
    def split_heads(t):                               # (T, D) -> (H, T, hd)
        return jnp.stack(
            [t[:, h * head_dim:(h + 1) * head_dim] for h in range(n_heads)],
            axis=0)

    qh = split_heads(q.astype(bf16))
    kh = split_heads(k.astype(bf16))
    vh = split_heads(v.astype(bf16))

    # --- Scores + softmax (sequential reassignment: one (H,T,T) live at a time)
    s = jnp.einsum('hqd,hkd->hqk', qh, kh, preferred_element_type=f32)
    s = s - jnp.max(s, axis=-1, keepdims=True)
    s = jnp.exp(s)
    # Exact normalization (tiny (H,T,1) divide): returned attention weights sum
    # to 1 like PyTorch's; the same p feeds p@v.
    p = s * (1.0 / jnp.sum(s, axis=-1, keepdims=True))

    if need_weights:
        attw_ref[0] = p                               # single store per step

    # --- Attention output + FUSED out-projection -------------------------------
    o = jnp.einsum('hqk,hkd->hqd', p.astype(bf16), vh,
                   preferred_element_type=f32)        # (H, T, hd) f32
    o_cat = jnp.concatenate([o[h] for h in range(n_heads)], axis=-1)  # (T, D)
    att = jnp.dot(o_cat.astype(bf16), wo_ref[...],
                  preferred_element_type=f32) + bo_ref[...]           # (T, D)

    # dropout_layer is identity in eval mode
    out_a = _layernorm(x + att)

    # --- Feed-forward -----------------------------------------------------------
    h1 = jnp.dot(out_a.astype(bf16), w1_ref[...],
                 preferred_element_type=f32) + b1_ref[...]
    h1 = jnp.maximum(h1, 0.0)
    c_t = jnp.dot(h1.astype(bf16), w2_ref[...],
                  preferred_element_type=f32) + b2_ref[...]

    out_ref[0] = _layernorm(out_a + c_t)


def prepare_kernel_params(params, n_heads):
    """Host-side (call ONCE): bf16 casts + 1/sqrt(head_dim) folded into Wq/bq."""
    bf16 = jnp.bfloat16
    D = params["wqT"].shape[0]
    hd = D // n_heads
    scale = 1.0 / math.sqrt(hd)
    return {
        "wq": (params["wqT"] * scale).astype(bf16),   # scale folded in
        "wk": params["wkT"].astype(bf16),
        "wv": params["wvT"].astype(bf16),
        "bq": params["bq"] * scale,                   # (1, D) f32, scale folded in
        "bk": params["bk"], "bv": params["bv"],
        "wo": params["woT"].astype(bf16), "bo": params["bo"],
        "w1": params["w1T"].astype(bf16), "b1": params["b1"],
        "w2": params["w2T"].astype(bf16), "b2": params["b2"],
    }


def transformer_block(x, kparams, n_heads, *, need_weights=True):
    B, T, D = x.shape
    head_dim = D // n_heads
    d_hidden = kparams["w1"].shape[1]

    order = ["wq", "wk", "wv", "bq", "bk", "bv", "wo", "bo", "w1", "b1", "w2", "b2"]
    weights = [kparams[name] for name in order]

    def const_spec(shape):                     # grid-invariant full-array block
        zeros = (0,) * len(shape)
        return pl.BlockSpec(shape, lambda b, _z=zeros: _z)

    in_specs = [pl.BlockSpec((1, T, D), lambda b: (b, 0, 0))]
    in_specs += [const_spec(tuple(w.shape)) for w in weights]

    if need_weights:
        out_shape = (jax.ShapeDtypeStruct((B, T, D), jnp.float32),
                     jax.ShapeDtypeStruct((B, n_heads, T, T), jnp.float32))
        out_specs = (pl.BlockSpec((1, T, D), lambda b: (b, 0, 0)),
                     pl.BlockSpec((1, n_heads, T, T), lambda b: (b, 0, 0, 0)))
        out_structs = out_shape
    else:
        out_shape = jax.ShapeDtypeStruct((B, T, D), jnp.float32)
        out_specs = pl.BlockSpec((1, T, D), lambda b: (b, 0, 0))
        out_structs = (out_shape,)

    # Advisory cost estimate for XLA's scheduler.
    flops = (2 * B * T * D * D * 4                          # q, k, v, out-proj
             + 2 * 2 * B * n_heads * T * T * head_dim       # scores + p@v
             + 2 * 2 * B * T * D * d_hidden)                # FFN
    transcendentals = B * n_heads * T * T + 2 * B * T

    def _nbytes(a):
        return int(np.prod(a.shape)) * a.dtype.itemsize

    bytes_accessed = (_nbytes(x) + sum(_nbytes(w) for w in weights)
                      + sum(_nbytes(s) for s in out_structs))

    kernel = functools.partial(transformer_block_kernel, n_heads, head_dim,
                               need_weights)

    return pl.pallas_call(
        kernel,
        out_shape=out_shape,
        grid=(B,),
        in_specs=in_specs,
        out_specs=out_specs,
        compiler_params=pltpu.CompilerParams(
            dimension_semantics=("parallel",),
            vmem_limit_bytes=32 * 1024 * 1024),
        cost_estimate=pl.CostEstimate(flops=flops,
                                      transcendentals=transcendentals,
                                      bytes_accessed=bytes_accessed),
    )(x, *weights)


def init_params(key, full_dims, d_hidden):
    """Deterministic synthetic parameters with the same shapes as the PyTorch module."""
    D, H = full_dims, d_hidden
    ks = jax.random.split(key, 6)
    s = 0.1
    # nn.MultiheadAttention: in_proj_weight (3D, D), in_proj_bias (3D,), out_proj (D, D) + (D,)
    in_proj_w = s * jax.random.normal(ks[0], (3 * D, D), jnp.float32)
    in_proj_b = s * jax.random.normal(ks[1], (3 * D,), jnp.float32)
    out_proj_w = s * jax.random.normal(ks[2], (D, D), jnp.float32)
    out_proj_b = jnp.zeros((D,), jnp.float32)
    # feedforward: Linear(D, H), Linear(H, D)
    w1 = s * jax.random.normal(ks[3], (H, D), jnp.float32)
    b1 = s * jax.random.normal(ks[4], (H,), jnp.float32)
    w2 = s * jax.random.normal(ks[5], (D, H), jnp.float32)
    b2 = jnp.zeros((D,), jnp.float32)

    # Pre-transpose so math is x @ W^T == x @ WT; biases as (1, N) rows.
    return {
        "wqT": in_proj_w[:D].T, "wkT": in_proj_w[D:2 * D].T, "wvT": in_proj_w[2 * D:].T,
        "bq": in_proj_b[:D][None, :], "bk": in_proj_b[D:2 * D][None, :], "bv": in_proj_b[2 * D:][None, :],
        "woT": out_proj_w.T, "bo": out_proj_b[None, :],
        "w1T": w1.T, "b1": b1[None, :],
        "w2T": w2.T, "b2": b2[None, :],
    }


def reference(x, params, n_heads):
    """Plain-JAX (f32) reference for validation."""
    B, T, D = x.shape
    hd = D // n_heads
    q = x @ params["wqT"] + params["bq"]
    k = x @ params["wkT"] + params["bk"]
    v = x @ params["wvT"] + params["bv"]
    qh = q.reshape(B, T, n_heads, hd).transpose(0, 2, 1, 3) / math.sqrt(hd)
    kh = k.reshape(B, T, n_heads, hd).transpose(0, 2, 1, 3)
    vh = v.reshape(B, T, n_heads, hd).transpose(0, 2, 1, 3)
    s = jnp.einsum("bhqd,bhkd->bhqk", qh, kh)
    p = jax.nn.softmax(s, axis=-1)
    o = jnp.einsum("bhqk,bhkd->bhqd", p, vh).transpose(0, 2, 1, 3).reshape(B, T, D)
    att = o @ params["woT"] + params["bo"]
    out_a = _layernorm(x + att)
    c_t = jnp.maximum(out_a @ params["w1T"] + params["b1"], 0.0) @ params["w2T"] + params["b2"]
    return _layernorm(out_a + c_t), p


if __name__ == "__main__":
    # Small shapes consistent with the module: (B, T, full_dims)
    B, T = 2, 8
    full_dims, d_hidden, n_heads = 32, 64, 4   # d_model unused in forward

    key = jax.random.PRNGKey(0)
    kx, kparam = jax.random.split(key)
    x = jax.random.normal(kx, (B, T, full_dims), jnp.float32)
    params = init_params(kparam, full_dims, d_hidden)

    # One-time weight prep (transpose/cast/scale-fold) hoisted out of the call.
    kernel_params = prepare_kernel_params(params, n_heads)

    out, att_w = transformer_block(x, kernel_params, n_heads, need_weights=True)
    out, att_w = jax.block_until_ready((out, att_w))

    ref_out, ref_w = reference(x, params, n_heads)
    # bf16 MXU operands (f32 accumulation) vs. the f32 reference -> loosened tolerance.
    np.testing.assert_allclose(np.asarray(out), np.asarray(ref_out), rtol=5e-2, atol=5e-2)
    np.testing.assert_allclose(np.asarray(att_w), np.asarray(ref_w), rtol=1e-2, atol=1e-2)

    assert out.shape == (B, T, full_dims)
    assert att_w.shape == (B, n_heads, T, T)
    print("KERNEL_OK")
</pallas_src>

<mosaic_0001>
module attributes {stable_mosaic.version = 11 : i64} {
  func.func @transformer_block_kernel(%arg0: i32, %arg1: memref<1x8x32xf32, #tpu.memory_space<vmem>>, %arg2: memref<32x32xbf16, #tpu.memory_space<vmem>>, %arg3: memref<32x32xbf16, #tpu.memory_space<vmem>>, %arg4: memref<32x32xbf16, #tpu.memory_space<vmem>>, %arg5: memref<1x32xf32, #tpu.memory_space<vmem>>, %arg6: memref<1x32xf32, #tpu.memory_space<vmem>>, %arg7: memref<1x32xf32, #tpu.memory_space<vmem>>, %arg8: memref<32x32xbf16, #tpu.memory_space<vmem>>, %arg9: memref<1x32xf32, #tpu.memory_space<vmem>>, %arg10: memref<32x64xbf16, #tpu.memory_space<vmem>>, %arg11: memref<1x64xf32, #tpu.memory_space<vmem>>, %arg12: memref<64x32xbf16, #tpu.memory_space<vmem>>, %arg13: memref<1x32xf32, #tpu.memory_space<vmem>>, %arg14: memref<1x8x32xf32, #tpu.memory_space<vmem>>, %arg15: memref<1x4x8x8xf32, #tpu.memory_space<vmem>>) attributes {dimension_semantics = [#tpu.dimension_semantics<parallel>], iteration_bounds = array<i64: 2>, scalar_prefetch = 0 : i64, scratch_operands = 0 : i64, tpu.core_type = #tpu.core_type<tc>, window_params = [{transform_indices = @transform_0, window_bounds = array<i64: 1, 8, 32>}, {pipeline_mode = #tpu.pipeline_mode<synchronous>, transform_indices = @transform_1, window_bounds = array<i64: 32, 32>}, {pipeline_mode = #tpu.pipeline_mode<synchronous>, transform_indices = @transform_2, window_bounds = array<i64: 32, 32>}, {pipeline_mode = #tpu.pipeline_mode<synchronous>, transform_indices = @transform_3, window_bounds = array<i64: 32, 32>}, {pipeline_mode = #tpu.pipeline_mode<synchronous>, transform_indices = @transform_4, window_bounds = array<i64: 1, 32>}, {pipeline_mode = #tpu.pipeline_mode<synchronous>, transform_indices = @transform_5, window_bounds = array<i64: 1, 32>}, {pipeline_mode = #tpu.pipeline_mode<synchronous>, transform_indices = @transform_6, window_bounds = array<i64: 1, 32>}, {pipeline_mode = #tpu.pipeline_mode<synchronous>, transform_indices = @transform_7, window_bounds = array<i64: 32, 32>}, {pipeline_mode = #tpu.pipeline_mode<synchronous>, transform_indices = @transform_8, window_bounds = array<i64: 1, 32>}, {pipeline_mode = #tpu.pipeline_mode<synchronous>, transform_indices = @transform_9, window_bounds = array<i64: 32, 64>}, {pipeline_mode = #tpu.pipeline_mode<synchronous>, transform_indices = @transform_10, window_bounds = array<i64: 1, 64>}, {pipeline_mode = #tpu.pipeline_mode<synchronous>, transform_indices = @transform_11, window_bounds = array<i64: 64, 32>}, {pipeline_mode = #tpu.pipeline_mode<synchronous>, transform_indices = @transform_12, window_bounds = array<i64: 1, 32>}, {transform_indices = @transform_13, window_bounds = array<i64: 1, 8, 32>}, {transform_indices = @transform_14, window_bounds = array<i64: 1, 4, 8, 8>}]} {
    %c0 = arith.constant 0 : index
    %c0_0 = arith.constant 0 : index
    %c0_1 = arith.constant 0 : index
    %0 = vector.load %arg1[%c0, %c0_0, %c0_1] : memref<1x8x32xf32, #tpu.memory_space<vmem>>, vector<1x8x32xf32>
    %1 = vector.shape_cast %0 : vector<1x8x32xf32> to vector<8x32xf32>
    %2 = arith.truncf %1 : vector<8x32xf32> to vector<8x32xbf16>
    %c0_2 = arith.constant 0 : index
    %c0_3 = arith.constant 0 : index
    %3 = vector.load %arg2[%c0_2, %c0_3] : memref<32x32xbf16, #tpu.memory_space<vmem>>, vector<32x32xbf16>
    %cst = arith.constant dense<0.000000e+00> : vector<8x32xf32>
    %4 = tpu.matmul %2, %3, %cst {dimension_numbers = #tpu.dot_dimension_numbers<[1], [0], [0], [1], [0, 0, 1, 1], [], []>} : vector<8x32xbf16>, vector<32x32xbf16>, vector<8x32xf32> -> vector<8x32xf32>
    %c0_4 = arith.constant 0 : index
    %c0_5 = arith.constant 0 : index
    %5 = vector.load %arg5[%c0_4, %c0_5] : memref<1x32xf32, #tpu.memory_space<vmem>>, vector<1x32xf32>
    %6 = vector.broadcast %5 : vector<1x32xf32> to vector<8x32xf32>
    %7 = arith.addf %4, %6 : vector<8x32xf32>
    %c0_6 = arith.constant 0 : index
    %c0_7 = arith.constant 0 : index
    %8 = vector.load %arg3[%c0_6, %c0_7] : memref<32x32xbf16, #tpu.memory_space<vmem>>, vector<32x32xbf16>
    %cst_8 = arith.constant dense<0.000000e+00> : vector<8x32xf32>
    %9 = tpu.matmul %2, %8, %cst_8 {dimension_numbers = #tpu.dot_dimension_numbers<[1], [0], [0], [1], [0, 0, 1, 1], [], []>} : vector<8x32xbf16>, vector<32x32xbf16>, vector<8x32xf32> -> vector<8x32xf32>
    %c0_9 = arith.constant 0 : index
    %c0_10 = arith.constant 0 : index
    %10 = vector.load %arg6[%c0_9, %c0_10] : memref<1x32xf32, #tpu.memory_space<vmem>>, vector<1x32xf32>
    %11 = vector.broadcast %10 : vector<1x32xf32> to vector<8x32xf32>
    %12 = arith.addf %9, %11 : vector<8x32xf32>
    %c0_11 = arith.constant 0 : index
    %c0_12 = arith.constant 0 : index
    %13 = vector.load %arg4[%c0_11, %c0_12] : memref<32x32xbf16, #tpu.memory_space<vmem>>, vector<32x32xbf16>
    %cst_13 = arith.constant dense<0.000000e+00> : vector<8x32xf32>
    %14 = tpu.matmul %2, %13, %cst_13 {dimension_numbers = #tpu.dot_dimension_numbers<[1], [0], [0], [1], [0, 0, 1, 1], [], []>} : vector<8x32xbf16>, vector<32x32xbf16>, vector<8x32xf32> -> vector<8x32xf32>
    %c0_14 = arith.constant 0 : index
    %c0_15 = arith.constant 0 : index
    %15 = vector.load %arg7[%c0_14, %c0_15] : memref<1x32xf32, #tpu.memory_space<vmem>>, vector<1x32xf32>
    %16 = vector.broadcast %15 : vector<1x32xf32> to vector<8x32xf32>
    %17 = arith.addf %14, %16 : vector<8x32xf32>
    %18 = arith.truncf %7 : vector<8x32xf32> to vector<8x32xbf16>
    %19 = vector.extract_strided_slice %18 {offsets = [0, 0], sizes = [8, 8], strides = [1, 1]} : vector<8x32xbf16> to vector<8x8xbf16>
    %20 = vector.extract_strided_slice %18 {offsets = [0, 8], sizes = [8, 8], strides = [1, 1]} : vector<8x32xbf16> to vector<8x8xbf16>
    %21 = vector.extract_strided_slice %18 {offsets = [0, 16], sizes = [8, 8], strides = [1, 1]} : vector<8x32xbf16> to vector<8x8xbf16>
    %22 = vector.extract_strided_slice %18 {offsets = [0, 24], sizes = [8, 8], strides = [1, 1]} : vector<8x32xbf16> to vector<8x8xbf16>
    %23 = vector.shape_cast %19 : vector<8x8xbf16> to vector<1x8x8xbf16>
    %24 = vector.shape_cast %20 : vector<8x8xbf16> to vector<1x8x8xbf16>
    %25 = vector.shape_cast %21 : vector<8x8xbf16> to vector<1x8x8xbf16>
    %26 = vector.shape_cast %22 : vector<8x8xbf16> to vector<1x8x8xbf16>
    %27 = tpu.concatenate %23, %24, %25, %26 in 0 : vector<1x8x8xbf16>, vector<1x8x8xbf16>, vector<1x8x8xbf16>, vector<1x8x8xbf16> -> vector<4x8x8xbf16>
    %28 = arith.truncf %12 : vector<8x32xf32> to vector<8x32xbf16>
    %29 = vector.extract_strided_slice %28 {offsets = [0, 0], sizes = [8, 8], strides = [1, 1]} : vector<8x32xbf16> to vector<8x8xbf16>
    %30 = vector.extract_strided_slice %28 {offsets = [0, 8], sizes = [8, 8], strides = [1, 1]} : vector<8x32xbf16> to vector<8x8xbf16>
    %31 = vector.extract_strided_slice %28 {offsets = [0, 16], sizes = [8, 8], strides = [1, 1]} : vector<8x32xbf16> to vector<8x8xbf16>
    %32 = vector.extract_strided_slice %28 {offsets = [0, 24], sizes = [8, 8], strides = [1, 1]} : vector<8x32xbf16> to vector<8x8xbf16>
    %33 = vector.shape_cast %29 : vector<8x8xbf16> to vector<1x8x8xbf16>
    %34 = vector.shape_cast %30 : vector<8x8xbf16> to vector<1x8x8xbf16>
    %35 = vector.shape_cast %31 : vector<8x8xbf16> to vector<1x8x8xbf16>
    %36 = vector.shape_cast %32 : vector<8x8xbf16> to vector<1x8x8xbf16>
    %37 = tpu.concatenate %33, %34, %35, %36 in 0 : vector<1x8x8xbf16>, vector<1x8x8xbf16>, vector<1x8x8xbf16>, vector<1x8x8xbf16> -> vector<4x8x8xbf16>
    %38 = arith.truncf %17 : vector<8x32xf32> to vector<8x32xbf16>
    %39 = vector.extract_strided_slice %38 {offsets = [0, 0], sizes = [8, 8], strides = [1, 1]} : vector<8x32xbf16> to vector<8x8xbf16>
    %40 = vector.extract_strided_slice %38 {offsets = [0, 8], sizes = [8, 8], strides = [1, 1]} : vector<8x32xbf16> to vector<8x8xbf16>
    %41 = vector.extract_strided_slice %38 {offsets = [0, 16], sizes = [8, 8], strides = [1, 1]} : vector<8x32xbf16> to vector<8x8xbf16>
    %42 = vector.extract_strided_slice %38 {offsets = [0, 24], sizes = [8, 8], strides = [1, 1]} : vector<8x32xbf16> to vector<8x8xbf16>
    %43 = vector.shape_cast %39 : vector<8x8xbf16> to vector<1x8x8xbf16>
    %44 = vector.shape_cast %40 : vector<8x8xbf16> to vector<1x8x8xbf16>
    %45 = vector.shape_cast %41 : vector<8x8xbf16> to vector<1x8x8xbf16>
    %46 = vector.shape_cast %42 : vector<8x8xbf16> to vector<1x8x8xbf16>
    %47 = tpu.concatenate %43, %44, %45, %46 in 0 : vector<1x8x8xbf16>, vector<1x8x8xbf16>, vector<1x8x8xbf16>, vector<1x8x8xbf16> -> vector<4x8x8xbf16>
    "tpu.trace_start"() <{level = 10 : i32, message = "hqd,hkd->hqk"}> : () -> ()
    %cst_16 = arith.constant dense<0.000000e+00> : vector<4x8x8xf32>
    %48 = tpu.matmul %27, %37, %cst_16 {dimension_numbers = #tpu.dot_dimension_numbers<[2], [2], [1], [1], [0, 0, 0, 1, 1, 1], [0], [0]>} : vector<4x8x8xbf16>, vector<4x8x8xbf16>, vector<4x8x8xf32> -> vector<4x8x8xf32>
    "tpu.trace_stop"() : () -> ()
    %cst_17 = arith.constant dense<0xFF800000> : vector<4x8xf32>
    %49 = vector.multi_reduction <maximumf>, %48, %cst_17 [2] : vector<4x8x8xf32> to vector<4x8xf32>
    %50 = vector.shape_cast %49 : vector<4x8xf32> to vector<4x8x1xf32>
    %51 = vector.broadcast %50 : vector<4x8x1xf32> to vector<4x8x8xf32>
    %52 = arith.subf %48, %51 : vector<4x8x8xf32>
    %53 = math.exp %52 : vector<4x8x8xf32>
    %cst_18 = arith.constant dense<0.000000e+00> : vector<4x8xf32>
    %54 = vector.multi_reduction <add>, %53, %cst_18 [2] : vector<4x8x8xf32> to vector<4x8xf32>
    %55 = vector.shape_cast %54 : vector<4x8xf32> to vector<4x8x1xf32>
    %cst_19 = arith.constant 1.000000e+00 : f32
    %56 = vector.broadcast %cst_19 : f32 to vector<4x8x1xf32>
    %57 = arith.divf %56, %55 : vector<4x8x1xf32>
    %58 = vector.broadcast %57 : vector<4x8x1xf32> to vector<4x8x8xf32>
    %59 = arith.mulf %53, %58 : vector<4x8x8xf32>
    %c0_20 = arith.constant 0 : index
    %c0_21 = arith.constant 0 : index
    %c0_22 = arith.constant 0 : index
    %c0_23 = arith.constant 0 : index
    %60 = vector.load %arg15[%c0_20, %c0_21, %c0_22, %c0_23] : memref<1x4x8x8xf32, #tpu.memory_space<vmem>>, vector<1x4x8x8xf32>
    %61 = vector.shape_cast %60 : vector<1x4x8x8xf32> to vector<4x8x8xf32>
    %62 = vector.shape_cast %59 : vector<4x8x8xf32> to vector<1x4x8x8xf32>
    tpu.vector_store %arg15[%c0_20, %c0_21, %c0_22, %c0_23], %62 {strides = array<i32>} : memref<1x4x8x8xf32, #tpu.memory_space<vmem>>, vector<1x4x8x8xf32>,
    %63 = arith.truncf %59 : vector<4x8x8xf32> to vector<4x8x8xbf16>
    "tpu.trace_start"() <{level = 10 : i32, message = "hqk,hkd->hqd"}> : () -> ()
    %cst_24 = arith.constant dense<0.000000e+00> : vector<4x8x8xf32>
    %64 = tpu.matmul %63, %47, %cst_24 {dimension_numbers = #tpu.dot_dimension_numbers<[2], [1], [1], [2], [0, 0, 0, 1, 1, 2], [0], [0]>} : vector<4x8x8xbf16>, vector<4x8x8xbf16>, vector<4x8x8xf32> -> vector<4x8x8xf32>
    "tpu.trace_stop"() : () -> ()
    %65 = vector.extract_strided_slice %64 {offsets = [0, 0, 0], sizes = [1, 8, 8], strides = [1, 1, 1]} : vector<4x8x8xf32> to vector<1x8x8xf32>
    %66 = vector.shape_cast %65 : vector<1x8x8xf32> to vector<8x8xf32>
    %67 = vector.extract_strided_slice %64 {offsets = [1, 0, 0], sizes = [1, 8, 8], strides = [1, 1, 1]} : vector<4x8x8xf32> to vector<1x8x8xf32>
    %68 = vector.shape_cast %67 : vector<1x8x8xf32> to vector<8x8xf32>
    %69 = vector.extract_strided_slice %64 {offsets = [2, 0, 0], sizes = [1, 8, 8], strides = [1, 1, 1]} : vector<4x8x8xf32> to vector<1x8x8xf32>
    %70 = vector.shape_cast %69 : vector<1x8x8xf32> to vector<8x8xf32>
    %71 = vector.extract_strided_slice %64 {offsets = [3, 0, 0], sizes = [1, 8, 8], strides = [1, 1, 1]} : vector<4x8x8xf32> to vector<1x8x8xf32>
    %72 = vector.shape_cast %71 : vector<1x8x8xf32> to vector<8x8xf32>
    %73 = tpu.concatenate %66, %68, %70, %72 in 1 : vector<8x8xf32>, vector<8x8xf32>, vector<8x8xf32>, vector<8x8xf32> -> vector<8x32xf32>
    %74 = arith.truncf %73 : vector<8x32xf32> to vector<8x32xbf16>
    %c0_25 = arith.constant 0 : index
    %c0_26 = arith.constant 0 : index
    %75 = vector.load %arg8[%c0_25, %c0_26] : memref<32x32xbf16, #tpu.memory_space<vmem>>, vector<32x32xbf16>
    %cst_27 = arith.constant dense<0.000000e+00> : vector<8x32xf32>
    %76 = tpu.matmul %74, %75, %cst_27 {dimension_numbers = #tpu.dot_dimension_numbers<[1], [0], [0], [1], [0, 0, 1, 1], [], []>} : vector<8x32xbf16>, vector<32x32xbf16>, vector<8x32xf32> -> vector<8x32xf32>
    %c0_28 = arith.constant 0 : index
    %c0_29 = arith.constant 0 : index
    %77 = vector.load %arg9[%c0_28, %c0_29] : memref<1x32xf32, #tpu.memory_space<vmem>>, vector<1x32xf32>
    %78 = vector.broadcast %77 : vector<1x32xf32> to vector<8x32xf32>
    %79 = arith.addf %76, %78 : vector<8x32xf32>
    %80 = arith.addf %1, %79 : vector<8x32xf32>
    %cst_30 = arith.constant dense<0.000000e+00> : vector<8xf32>
    %81 = vector.multi_reduction <add>, %80, %cst_30 [1] : vector<8x32xf32> to vector<8xf32>
    %82 = vector.shape_cast %81 : vector<8xf32> to vector<8x1xf32>
    %cst_31 = arith.constant 3.200000e+01 : f32
    %83 = vector.broadcast %cst_31 : f32 to vector<8x1xf32>
    %84 = arith.divf %82, %83 : vector<8x1xf32>
    %85 = vector.broadcast %84 : vector<8x1xf32> to vector<8x32xf32>
    %86 = arith.subf %80, %85 : vector<8x32xf32>
    %87 = arith.mulf %86, %86 : vector<8x32xf32>
    %cst_32 = arith.constant dense<0.000000e+00> : vector<8xf32>
    %88 = vector.multi_reduction <add>, %87, %cst_32 [1] : vector<8x32xf32> to vector<8xf32>
    %89 = vector.shape_cast %88 : vector<8xf32> to vector<8x1xf32>
    %cst_33 = arith.constant 3.200000e+01 : f32
    %90 = vector.broadcast %cst_33 : f32 to vector<8x1xf32>
    %91 = arith.divf %89, %90 : vector<8x1xf32>
    %cst_34 = arith.constant 9.99999974E-6 : f32
    %92 = vector.broadcast %cst_34 : f32 to vector<8x1xf32>
    %93 = arith.addf %91, %92 : vector<8x1xf32>
    %94 = math.rsqrt %93 : vector<8x1xf32>
    %95 = vector.broadcast %94 : vector<8x1xf32> to vector<8x32xf32>
    %96 = arith.mulf %86, %95 : vector<8x32xf32>
    %97 = arith.truncf %96 : vector<8x32xf32> to vector<8x32xbf16>
    %c0_35 = arith.constant 0 : index
    %c0_36 = arith.constant 0 : index
    %98 = vector.load %arg10[%c0_35, %c0_36] : memref<32x64xbf16, #tpu.memory_space<vmem>>, vector<32x64xbf16>
    %cst_37 = arith.constant dense<0.000000e+00> : vector<8x64xf32>
    %99 = tpu.matmul %97, %98, %cst_37 {dimension_numbers = #tpu.dot_dimension_numbers<[1], [0], [0], [1], [0, 0, 1, 1], [], []>} : vector<8x32xbf16>, vector<32x64xbf16>, vector<8x64xf32> -> vector<8x64xf32>
    %c0_38 = arith.constant 0 : index
    %c0_39 = arith.constant 0 : index
    %100 = vector.load %arg11[%c0_38, %c0_39] : memref<1x64xf32, #tpu.memory_space<vmem>>, vector<1x64xf32>
    %101 = vector.broadcast %100 : vector<1x64xf32> to vector<8x64xf32>
    %102 = arith.addf %99, %101 : vector<8x64xf32>
    %cst_40 = arith.constant 0.000000e+00 : f32
    %103 = vector.broadcast %cst_40 : f32 to vector<8x64xf32>
    %104 = arith.maximumf %102, %103 : vector<8x64xf32>
    %105 = arith.truncf %104 : vector<8x64xf32> to vector<8x64xbf16>
    %c0_41 = arith.constant 0 : index
    %c0_42 = arith.constant 0 : index
    %106 = vector.load %arg12[%c0_41, %c0_42] : memref<64x32xbf16, #tpu.memory_space<vmem>>, vector<64x32xbf16>
    %cst_43 = arith.constant dense<0.000000e+00> : vector<8x32xf32>
    %107 = tpu.matmul %105, %106, %cst_43 {dimension_numbers = #tpu.dot_dimension_numbers<[1], [0], [0], [1], [0, 0, 1, 1], [], []>} : vector<8x64xbf16>, vector<64x32xbf16>, vector<8x32xf32> -> vector<8x32xf32>
    %c0_44 = arith.constant 0 : index
    %c0_45 = arith.constant 0 : index
    %108 = vector.load %arg13[%c0_44, %c0_45] : memref<1x32xf32, #tpu.memory_space<vmem>>, vector<1x32xf32>
    %109 = vector.broadcast %108 : vector<1x32xf32> to vector<8x32xf32>
    %110 = arith.addf %107, %109 : vector<8x32xf32>
    %111 = arith.addf %96, %110 : vector<8x32xf32>
    %cst_46 = arith.constant dense<0.000000e+00> : vector<8xf32>
    %112 = vector.multi_reduction <add>, %111, %cst_46 [1] : vector<8x32xf32> to vector<8xf32>
    %113 = vector.shape_cast %112 : vector<8xf32> to vector<8x1xf32>
    %cst_47 = arith.constant 3.200000e+01 : f32
    %114 = vector.broadcast %cst_47 : f32 to vector<8x1xf32>
    %115 = arith.divf %113, %114 : vector<8x1xf32>
    %116 = vector.broadcast %115 : vector<8x1xf32> to vector<8x32xf32>
    %117 = arith.subf %111, %116 : vector<8x32xf32>
    %118 = arith.mulf %117, %117 : vector<8x32xf32>
    %cst_48 = arith.constant dense<0.000000e+00> : vector<8xf32>
    %119 = vector.multi_reduction <add>, %118, %cst_48 [1] : vector<8x32xf32> to vector<8xf32>
    %120 = vector.shape_cast %119 : vector<8xf32> to vector<8x1xf32>
    %cst_49 = arith.constant 3.200000e+01 : f32
    %121 = vector.broadcast %cst_49 : f32 to vector<8x1xf32>
    %122 = arith.divf %120, %121 : vector<8x1xf32>
    %cst_50 = arith.constant 9.99999974E-6 : f32
    %123 = vector.broadcast %cst_50 : f32 to vector<8x1xf32>
    %124 = arith.addf %122, %123 : vector<8x1xf32>
    %125 = math.rsqrt %124 : vector<8x1xf32>
    %126 = vector.broadcast %125 : vector<8x1xf32> to vector<8x32xf32>
    %127 = arith.mulf %117, %126 : vector<8x32xf32>
    %c0_51 = arith.constant 0 : index
    %c0_52 = arith.constant 0 : index
    %c0_53 = arith.constant 0 : index
    %128 = vector.load %arg14[%c0_51, %c0_52, %c0_53] : memref<1x8x32xf32, #tpu.memory_space<vmem>>, vector<1x8x32xf32>
    %129 = vector.shape_cast %128 : vector<1x8x32xf32> to vector<8x32xf32>
    %130 = vector.shape_cast %127 : vector<8x32xf32> to vector<1x8x32xf32>
    tpu.vector_store %arg14[%c0_51, %c0_52, %c0_53], %130 {strides = array<i32>} : memref<1x8x32xf32, #tpu.memory_space<vmem>>, vector<1x8x32xf32>,
    return
  }
  func.func @transform_0(%arg0: i32) -> (i32, i32, i32) {
    %c0_i32 = arith.constant 0 : i32
    %c0_i32_0 = arith.constant 0 : i32
    %c0_i32_1 = arith.constant 0 : i32
    return %arg0, %c0_i32, %c0_i32_0 : i32, i32, i32
  }
  func.func @transform_1(%arg0: i32) -> (i32, i32) {
    %c0_i32 = arith.constant 0 : i32
    %c0_i32_0 = arith.constant 0 : i32
    %c0_i32_1 = arith.constant 0 : i32
    return %c0_i32, %c0_i32_0 : i32, i32
  }
  func.func @transform_2(%arg0: i32) -> (i32, i32) {
    %c0_i32 = arith.constant 0 : i32
    %c0_i32_0 = arith.constant 0 : i32
    %c0_i32_1 = arith.constant 0 : i32
    return %c0_i32, %c0_i32_0 : i32, i32
  }
  func.func @transform_3(%arg0: i32) -> (i32, i32) {
    %c0_i32 = arith.constant 0 : i32
    %c0_i32_0 = arith.constant 0 : i32
    %c0_i32_1 = arith.constant 0 : i32
    return %c0_i32, %c0_i32_0 : i32, i32
  }
  func.func @transform_4(%arg0: i32) -> (i32, i32) {
    %c0_i32 = arith.constant 0 : i32
    %c0_i32_0 = arith.constant 0 : i32
    %c0_i32_1 = arith.constant 0 : i32
    return %c0_i32, %c0_i32_0 : i32, i32
  }
  func.func @transform_5(%arg0: i32) -> (i32, i32) {
    %c0_i32 = arith.constant 0 : i32
    %c0_i32_0 = arith.constant 0 : i32
    %c0_i32_1 = arith.constant 0 : i32
    return %c0_i32, %c0_i32_0 : i32, i32
  }
  func.func @transform_6(%arg0: i32) -> (i32, i32) {
    %c0_i32 = arith.constant 0 : i32
    %c0_i32_0 = arith.constant 0 : i32
    %c0_i32_1 = arith.constant 0 : i32
    return %c0_i32, %c0_i32_0 : i32, i32
  }
  func.func @transform_7(%arg0: i32) -> (i32, i32) {
    %c0_i32 = arith.constant 0 : i32
    %c0_i32_0 = arith.constant 0 : i32
    %c0_i32_1 = arith.constant 0 : i32
    return %c0_i32, %c0_i32_0 : i32, i32
  }
  func.func @transform_8(%arg0: i32) -> (i32, i32) {
    %c0_i32 = arith.constant 0 : i32
    %c0_i32_0 = arith.constant 0 : i32
    %c0_i32_1 = arith.constant 0 : i32
    return %c0_i32, %c0_i32_0 : i32, i32
  }
  func.func @transform_9(%arg0: i32) -> (i32, i32) {
    %c0_i32 = arith.constant 0 : i32
    %c0_i32_0 = arith.constant 0 : i32
    %c0_i32_1 = arith.constant 0 : i32
    return %c0_i32, %c0_i32_0 : i32, i32
  }
  func.func @transform_10(%arg0: i32) -> (i32, i32) {
    %c0_i32 = arith.constant 0 : i32
    %c0_i32_0 = arith.constant 0 : i32
    %c0_i32_1 = arith.constant 0 : i32
    return %c0_i32, %c0_i32_0 : i32, i32
  }
  func.func @transform_11(%arg0: i32) -> (i32, i32) {
    %c0_i32 = arith.constant 0 : i32
    %c0_i32_0 = arith.constant 0 : i32
    %c0_i32_1 = arith.constant 0 : i32
    return %c0_i32, %c0_i32_0 : i32, i32
  }
  func.func @transform_12(%arg0: i32) -> (i32, i32) {
    %c0_i32 = arith.constant 0 : i32
    %c0_i32_0 = arith.constant 0 : i32
    %c0_i32_1 = arith.constant 0 : i32
    return %c0_i32, %c0_i32_0 : i32, i32
  }
  func.func @transform_13(%arg0: i32) -> (i32, i32, i32) {
    %c0_i32 = arith.constant 0 : i32
    %c0_i32_0 = arith.constant 0 : i32
    %c0_i32_1 = arith.constant 0 : i32
    return %arg0, %c0_i32, %c0_i32_0 : i32, i32, i32
  }
  func.func @transform_14(%arg0: i32) -> (i32, i32, i32, i32) {
    %c0_i32 = arith.constant 0 : i32
    %c0_i32_0 = arith.constant 0 : i32
    %c0_i32_1 = arith.constant 0 : i32
    %c0_i32_2 = arith.constant 0 : i32
    return %arg0, %c0_i32, %c0_i32_0, %c0_i32_1 : i32, i32, i32, i32
  }
}

</mosaic_0001>

<bundles_post_ra>
// kernel: tpu_custom_call.1
= control target key start
LH: loop header
LB: loop body
LE: loop exit
PB: predicated region body
PF: predicated region fallthrough
CT: control target
= control target key end

     0   :  { %s2655_s0 = inlined_call_operand.vmem [shape: f32[2,8,32], index: 0, kind: input, shape index: {}]   ;;  %s2656_s1 = inlined_call_operand.vmem [shape: bf16[32,32], index: 1, kind: input, shape index: {}]   ;;  %s2657_s2 = inlined_call_operand.vmem [shape: bf16[32,32], index: 2, kind: input, shape index: {}]   ;;  %s2658_s3 = inlined_call_operand.hbm [shape: bf16[32,32], index: 3, kind: input, shape index: {}]   ;;  %s2659_s4 = inlined_call_operand.vmem [shape: f32[1,32], index: 4, kind: input, shape index: {}]   ;;  %s2660_s5 = inlined_call_operand.vmem [shape: f32[1,32], index: 5, kind: input, shape index: {}]   ;;  %s2661_s6 = inlined_call_operand.hbm [shape: f32[1,32], index: 6, kind: input, shape index: {}]   ;;  %s2662_s7 = inlined_call_operand.hbm [shape: bf16[32,32], index: 7, kind: input, shape index: {}]   ;;  %s2663_s8 = inlined_call_operand.hbm [shape: f32[1,32], index: 8, kind: input, shape index: {}]   ;;  %s2664_s9 = inlined_call_operand.vmem [shape: bf16[32,64], index: 9, kind: input, shape index: {}]   ;;  %s2665_s10 = inlined_call_operand.vmem [shape: f32[1,64], index: 10, kind: input, shape index: {}]   ;;  %s2666_s11 = inlined_call_operand.vmem [shape: bf16[64,32], index: 11, kind: input, shape index: {}]   ;;  %s2667_s12 = inlined_call_operand.vmem [shape: f32[1,32], index: 12, kind: input, shape index: {}]   ;;  %s2668_s13 = inlined_call_operand.hbm [shape: f32[2,8,32], index: 13, kind: output, shape index: {0}]   ;;  %s2669_s14 = inlined_call_operand.hbm [shape: f32[2,4,8,8], index: 14, kind: output, shape index: {1}]  }
   0x1   :  { %2681 = sst [smem:[#allocation24_spill]] %s2658_s3 }
   0x2   :  { %2682 = sst [smem:[#allocation25_spill]] %s2661_s6 }
   0x3   :  { %2683 = sst [smem:[#allocation26_spill]] %s2668_s13 }
   0x4   :  { %2684 = sst [smem:[#allocation27_spill]] %s2669_s14 }
   0x5   :  { %20 = vsyncpa [#allocation3], 0 }
   0x6   :  { %21 = vsyncpa [#allocation6], 0 }
   0x7   :  { %22 = vsyncpa [#allocation9], 0 }
   0x8   :  { %23 = vsyncpa [#allocation4], 0 }
   0x9   :  { %25 = vsyncpa [#allocation4 + $0x1], 0 }
   0xa   :  { %26 = vsyncpa [#allocation12], 0 }
   0xb   :  { %28 = vsyncpa [#allocation12 + $0x1], 0  ;;  %s2243_s29 = smov 0   ;;  %s2245_s30 = smov 0  }
   0xc   :  { %s2247_s15 = smov 0   ;;  %s2249_s16 = smov 0  }
   0xd LB: > { %2685 = sst [smem:[#allocation18_spill]] %s2137_s29  ;;  %s2264_s17 = sadd.s32 4294967295, %s2149_s16   ;;  %s2149_s16 = sphi %s2249_s16, %s2713_s16   ;;  %s2145_s15 = sphi %s2247_s15, %s2715_s15   ;;  %s2141_s30 = sphi %s2245_s30, %s2717_s30   ;;  %s2137_s29 = sphi %s2243_s29, %s2716_s29  }
   0xe   : > { %2686 = sst [smem:[#allocation19_spill]] %s2145_s15  ;;  %s1608_s18 = sadd.s32 4294967294, %s2149_s16  }
   0xf   : > { %2687 = sst [smem:[#allocation20_spill]] %s2149_s16  ;;  %s2268_s19 = sadd.s32 1, %s2149_s16  }
  0x10   : > { %2688 = sst [smem:[#allocation21_spill]] %s2268_s19  ;;  %s319_s20 = sadd.s32 1, %s2145_s15 }
  0x11   : > { %s316_s21 = ssub.s32 %s2149_s16, %s2268_s19  ;;  %p329_p0 = scmp.ne.s32.totalorder %s2145_s15, %s2141_s30 }
  0x12   : > { %p317_p1 = scmp.eq.s32.totalorder %s316_s21, 0  ;;  %p330_p2 = scmp.eq.s32.totalorder %s2264_s17, 1 }
  0x13   : > { %p335_p3 = scmp.ne.s32.totalorder %s2141_s30, %s2137_s29  ;;  %p336_p4 = scmp.eq.s32.totalorder %s1608_s18, 1 }
  0x14   : > { %s2279_s22 = scalar_select %p317_p1, %s2145_s15, %s319_s20  }
  0x15   : > { %p2281_p5 = por %p330_p2, %p329_p0  ;;  %p2285_p6 = por %p336_p4, %p335_p3 }
  0x16   : > { %2689 = sst [smem:[#allocation22_spill]] %s2279_s22  ;;  %p1609_p7 = scmp.ge.s32.totalorder %s2149_s16, 1 }
  0x17   : > { %s2690_s23 = scalar_select %p2281_p5, 1, 0 }
  0x18   : > { %s2691_s24 = scalar_select %p2285_p6, 1, 0 }
  0x19   : > { %p369_p8 = scmp.lt.s32.totalorder %s2149_s16, 3  ;;  %p2676_p9 = scmp.eq.s32.totalorder %s2264_s17, 0 }
  0x1a   : > { %2692 = sst [smem:[#allocation23_spill]] %s2691_s24  ;;  %s2151_s26 = smov [#allocation5]  }
  0x1b   : > { %p2292_p10 = pnand %p1609_p7, %p369_p8  ;;  %s407_s27 = sshll.u32 %s2151_s26, 4  ;;  %s408_s27 = int_to_ptr.vmem [resolvable:$true] %s407_s27 }
  0x1c   : > { %s2152_s28 = smov [#allocation2]   ;;  %s2153_s21 = smov [#allocation7]  }
  0x1d   : > { %s2693_s25 = scalar_select %p2292_p10, 1, 0 }
  0x1e   : > { %p1821_p11 = pneg %p2292_p10  ;;  %s387_s18 = sshll.u32 %s2152_s28, 4  ;;  %s2304_s18 = int_to_ptr.vmem [resolvable:$true] %s387_s18 }
  0x1f   : > { %s2306_s22 = sshll.u32 %s2153_s21, 4  ;;  %s2695_s6 = sld [smem:[#allocation25_spill]]  ;;  %s418_s22 = int_to_ptr.vmem [resolvable:$true] %s2306_s22 }
  0x20   : > { %p2300_p12 = pnand %p2676_p9, %p1821_p11 }
  0x22   : > { %p2316_p0 = pneg %p2300_p12 }
  0x25   : > { %s1931_s26 = scalar_lea.hbm %s2695_s6, 16 }
  0x26   : > { %p1932_p13 = scmp.ne.s32.totalorder %s2695_s6, %s1931_s26  ;;  %p1938_p3 = scmp.lt.u32.totalorder %s1931_s26, %s2695_s6 }
  0x28   : > { %p1934_p1 = pnand %p2316_p0, %p1932_p13 }
  0x2a   : > { %p1935_p2 = pneg %p1934_p1 }
  0x2c   : > { %p1940_p4 = pnand %p1938_p3, %p1935_p2 }
  0x2e   : > { %1943 = shalt.err (!%p1940_p4)
}
  0x2f   : > { %s1944_s15 = scalar_lea.vmem %s408_s27, 16  ;;  %s1951_s29 = scalar_lea.vmem %s408_s27, 32 }
  0x30   : > { %p1945_p7 = scmp.ne.s32.totalorder %s408_s27, %s1944_s15  ;;  %p1952_p9 = scmp.lt.s32.totalorder %s408_s27, %s408_s27 }
  0x31   : > { %p1953_p6 = scmp.lt.s32.totalorder %s1951_s29, %s1944_s15 }
  0x32   : > { %p1947_p8 = pnand %p1945_p7, %p2316_p0 }
  0x33   : > { %p1954_p5 = por %p1953_p6, %p1952_p9 }
  0x34   : > { %p1948_p11 = pneg %p1947_p8 }
  0x36   : > { %p1955_p10 = pnand %p1954_p5, %p1948_p11 }
  0x38   : > { %1958 = shalt.err (!%p1955_p10)
}
  0x39   : > { %1827 = dma.hbm_to_vmem [thread:$0]  (!%p2300_p12), %s2695_s6, 16, %s408_s27, [#allocation6]  }
  0x3a   : > { %s2697_s3 = sld [smem:[#allocation24_spill]] }
  0x40   : > { %s1959_s21 = scalar_lea.hbm %s2697_s3, 256 }
  0x41   : > { %p1960_p13 = scmp.ne.s32.totalorder %s2697_s3, %s1959_s21  ;;  %p1966_p5 = scmp.lt.u32.totalorder %s1959_s21, %s2697_s3 }
  0x43   : > { %p1962_p1 = pnand %p1960_p13, %p2316_p0 }
  0x45   : > { %p1963_p6 = pneg %p1962_p1 }
  0x47   : > { %p1968_p9 = pnand %p1966_p5, %p1963_p6 }
  0x49   : > { %1971 = shalt.err (!%p1968_p9)
}
  0x4a   : > { %s1972_s27 = scalar_lea.vmem %s2304_s18, 256  ;;  %p1980_p4 = scmp.lt.s32.totalorder %s2304_s18, %s2304_s18 }
  0x4b   : > { %p1973_p10 = scmp.ne.s32.totalorder %s2304_s18, %s1972_s27  ;;  %p1981_p7 = scmp.lt.s32.totalorder %s1972_s27, %s1972_s27 }
  0x4d   : > { %p1975_p2 = pnand %p1973_p10, %p2316_p0  ;;  %p1982_p8 = por %p1981_p7, %p1980_p4 }
  0x4f   : > { %p1976_p3 = pneg %p1975_p2 }
  0x51   : > { %p1983_p11 = pnand %p1982_p8, %p1976_p3 }
  0x53   : > { %1986 = shalt.err (!%p1983_p11)
}
  0x54   : > { %s2154_s13 = smov 64   ;;  %s2155_s14 = smov 4  }
  0x55   : > { %1824 = dma.hbm_to_vmem [thread:$0]  (!%p2300_p12), %s2697_s3, 256, %s2304_s18, [#allocation3], %s2154_s13, %s2154_s13, %s2155_s14  }
  0x56   : > { %s1987_s21 = scalar_lea.hbm %s2662_s7, 256 }
  0x57   : > { %p1988_p13 = scmp.ne.s32.totalorder %s2662_s7, %s1987_s21  ;;  %p1994_p5 = scmp.lt.u32.totalorder %s1987_s21, %s2662_s7 }
  0x59   : > { %p1990_p1 = pnand %p1988_p13, %p2316_p0 }
  0x5b   : > { %p1991_p6 = pneg %p1990_p1 }
  0x5d   : > { %p1996_p9 = pnand %p1994_p5, %p1991_p6 }
  0x5f   : > { %1999 = shalt.err (!%p1996_p9)
}
  0x60   : > { %s2000_s19 = scalar_lea.vmem %s418_s22, 256  ;;  %p2008_p4 = scmp.lt.s32.totalorder %s418_s22, %s418_s22 }
  0x61   : > { %p2001_p10 = scmp.ne.s32.totalorder %s418_s22, %s2000_s19  ;;  %p2009_p7 = scmp.lt.s32.totalorder %s2000_s19, %s2000_s19 }
  0x63   : > { %p2003_p2 = pnand %p2001_p10, %p2316_p0  ;;  %p2010_p8 = por %p2009_p7, %p2008_p4 }
  0x65   : > { %p2004_p3 = pneg %p2003_p2 }
  0x67   : > { %p2011_p11 = pnand %p2010_p8, %p2004_p3 }
  0x69   : > { %2014 = shalt.err (!%p2011_p11)
}
  0x6a   : > { %1830 = dma.hbm_to_vmem [thread:$0]  (!%p2300_p12), %s2662_s7, 256, %s418_s22, [#allocation6], %s2154_s13, %s2154_s13, %s2155_s14  }
  0x6b   : > { %s2156_s6 = smov [#allocation8]   ;;  %s2015_s15 = scalar_lea.hbm %s2663_s8, 16 }
  0x6c   : > { %s431_s16 = sshll.u32 %s2156_s6, 4  ;;  %p2016_p13 = scmp.ne.s32.totalorder %s2663_s8, %s2015_s15  ;;  %s432_s16 = int_to_ptr.vmem [resolvable:$true] %s431_s16 }
  0x6d   : > { %p2022_p5 = scmp.lt.u32.totalorder %s2015_s15, %s2663_s8 }
  0x6e   : > { %p2018_p1 = pnand %p2016_p13, %p2316_p0 }
  0x70   : > { %p2019_p6 = pneg %p2018_p1 }
  0x72   : > { %p2024_p9 = pnand %p2022_p5, %p2019_p6 }
  0x74   : > { %2027 = shalt.err (!%p2024_p9)
}
  0x75   : > { %s2028_s22 = scalar_lea.vmem %s432_s16, 16  ;;  %s2035_s13 = scalar_lea.vmem %s432_s16, 32 }
  0x76   : > { %p2029_p10 = scmp.ne.s32.totalorder %s432_s16, %s2028_s22  ;;  %p2036_p4 = scmp.lt.s32.totalorder %s432_s16, %s432_s16 }
  0x77   : > { %p2037_p7 = scmp.lt.s32.totalorder %s2035_s13, %s2028_s22 }
  0x78   : > { %p2031_p2 = pnand %p2029_p10, %p2316_p0 }
  0x79   : > { %p2038_p8 = por %p2037_p7, %p2036_p4 }
  0x7a   : > { %p2032_p3 = pneg %p2031_p2 }
  0x7c   : > { %p2039_p11 = pnand %p2038_p8, %p2032_p3 }
  0x7e   : > { %2042 = shalt.err (!%p2039_p11)
}
  0x7f   : > { %1833 = dma.hbm_to_vmem [thread:$0]  (!%p2300_p12), %s2663_s8, 16, %s432_s16, [#allocation9]  }
  0x80   : > { %p2698_p13 = scmp.ne.s32.totalorder %s2693_s25, 0 }
  0x81   : > { %p2699_p1 = scmp.eq.s32.totalorder (!%p2698_p13), %s2264_s17, 0 }
  0x82   : > { %463 = sbr.rel (%p2698_p13) target bundleno = 2644 (0xa54), region = 72 }
  0x89   : > { %2116 = dma.done.wait (%p2699_p1), [#allocation3], 256   ;;  %p2700_p0 = pmov %p2699_p1 }
  0x8b   : > { %2118 = vsyncadd (%p2700_p0), [#allocation3], 4294967040  ;;  %p2701_p6 = pmov %p2700_p0 }
  0x8c   : > { %p2702_p5 = pmov %p2700_p0 }
  0x8d   : > { %2120 = dma.done.wait (%p2701_p6), [#allocation6], 272  }
  0x8e   : > { %2122 = vsyncadd (%p2702_p5), [#allocation6], 4294967024  ;;  %p2703_p9 = pmov %p2700_p0 }
  0x8f   : > { %p2704_p12 = pmov %p2700_p0 }
  0x90   : > { %2124 = dma.done.wait (%p2703_p9), [#allocation9], 16  }
  0x91   : > { %2126 = vsyncadd (%p2704_p12), [#allocation9], 4294967280  ;;  %p525_p10 = scmp.lt.s32.totalorder %s2264_s17, 1  ;;  %v2157_v0 = vmov 0.0   ;;  %vm2158_vm0 = vmmov 0   ;;  %v1897_v1 = vld [vmem:[%s2656_s1] sm:$0xff]  }
  0x92   : > { %1701 = vmatprep.subr.bf16.mxu0 %v2157_v0  ;;  %1709 = vmatprep.subr.bf16.mxu1 %v2157_v0  ;;  %v1898_v2 = vld [vmem:[%s2657_s2] sm:$0xff]   ;;  %v1899_v3 = vld [vmem:[%s2656_s1 + $0x8] sm:$0xff]   ;;  %vm555_vm1 = vcmask 261120   ;;  %vm749_vm2 = vcmask 64512   ;;  %s2161_s20 = smov 112   ;;  %vm993_vm3 = vcmask 1043456  }
  0x93   : > { %1705 = vmatprep.mubr.msk.bf16.mxu0 %vm2158_vm0, %v2157_v0  ;;  %1713 = vmatprep.mubr.msk.bf16.mxu1 %vm2158_vm0, %v2157_v0  ;;  %s526_s3 = scalar_select %p525_p10, %s2264_s17, 1  ;;  %v1900_v4 = vld [vmem:[%s2657_s2 + $0x8] sm:$0xff]   ;;  %v1901_v7 = vld [vmem:[#allocation2] sm:$0xff]   ;;  %v1631_v30 = vld [vmem:[#allocation5] ss:$0 sm:$0xff]  ;;  %vm1188_vm4 = vcmask 130048  }
  0x94   : > { %1702 = vmatpush3.bf16.msra.mxu0 %v1897_v1  ;;  %1710 = vmatpush3.bf16.msra.mxu1 %v1898_v2  ;;  %v1902_v8 = vld [vmem:[#allocation2 + $0x8] sm:$0xff]   ;;  %v1623_v9 = vld [vmem:[%s2659_s4] ss:$0 sm:$0xff]  ;;  %s2502_s28 = sand.u32 1, %s2141_s30   ;;  %s2162_s16 = smov 8   ;;  %vm1190_vm5 = vcmask 195584  }
  0x95   : > { %s1622_s25 = sshll.u32 %s526_s3, 3  ;;  %1703 = vmatprep.subr.bf16.mxu0 %v2157_v0  ;;  %1711 = vmatprep.subr.bf16.mxu1 %v2157_v0  ;;  %v1627_v10 = vld [vmem:[%s2660_s5] ss:$0 sm:$0xff]  ;;  %s2159_s3 = smov 120   ;;  %vm1382_vm6 = vcmask 523264  }
  0x96   : > { %s528_s21 = scalar_lea.vmem %s2655_s0, %s1622_s25  ;;  %s2160_s25 = smov 104  }
  0x97   : > { %v2431_v5 = vld [vmem:[%s528_s21] sm:$0xff]  ;;  %s1621_s24 = sshll.u32 %s2502_s28, 5  ;;  %s2163_s26 = smov 16  }
  0x98   : > { %v531_v6 = vpack.c.bf16 %v2431_v5, %v2431_v5  ;;  %1704 = vmatpush3.bf16.msra.mxu0 %v1899_v3  ;;  %1712 = vmatpush3.bf16.msra.mxu1 %v1900_v4  ;;  %s2505_s6 = scalar_lea.vmem [#allocation11], %s1621_s24  ;;  %s2164_s21 = smov 24  }
  0x99   : > { %1717 = vmatprep.subr.bf16.mxu0 %v2157_v0  ;;  %1725 = vmatprep.subr.bf16.mxu1 %v2157_v0  ;;  %s1473_s27 = sshll.u32 %s2505_s6, 4  ;;  %s1664_s19 = sshll.u32 %s2264_s17, 9  ;;  %s2574_s27 = int_to_ptr.vmem [resolvable:$true] %s1473_s27 }
  0x9a   : > { %s2705_s14 = sld [smem:[#allocation27_spill]]  ;;  %p2706_p3 = scmp.ne.s32.totalorder %s2690_s23, 0 }
  0x9b   : > { %1706 = vmatmul.mubr.msk.bf16.vlgmr.msra.gmra.mrb[0].mxu0 %vm555_vm1, %v531_v6  ;;  %1714 = vmatmul.mubr.msk.bf16.vlgmr.msra.gmra.mrb[0].mxu1 %vm555_vm1, %v531_v6 }
  0x9c   : > { %1721 = vmatprep.mubr.msk.bf16.mxu0 %vm2158_vm0, %v2157_v0  ;;  %1727 = vmatprep.mubr.msk.bf16.mxu1 %vm2158_vm0, %v2157_v0 }
  0x9d   : > { %1718 = vmatpush3.bf16.msra.mxu0 %v1901_v7 }
  0x9e   : > { %1719 = vmatprep.subr.bf16.mxu0 %v2157_v0 }
  0xa0   : > { %s2579_s18 = scalar_lea.hbm %s2705_s14, %s1664_s19 }
  0xa1   : > { %1720 = vmatpush3.bf16.msra.mxu0 %v1902_v8 }
  0xa2   : > { %1731 = vmatprep.subr.bf16.mxu0 %v2157_v0 }
  0xa4   : > { %1722 = vmatmul.mubr.msk.bf16.vlgmr.msra.gmra.mrb[4].mxu0 %vm555_vm1, %v531_v6 }
  0xa5   : > { %1733 = vmatprep.mubr.msk.bf16.mxu0 %vm2158_vm0, %v2157_v0 }
 0x16e   : > { %v593_v11 = vpop.f32.mrb[0].mxu0  ;;  %v656_v13 = vpop.f32.mrb[0].mxu1 }
 0x16f   : > { %v594_v12 = vadd.f32 %v1623_v9, %v593_v11  ;;  %v1707_v14 = vpop.f32.mrb[1].mxu0  ;;  %v657_v15 = vadd.f32 %v1627_v10, %v656_v13  ;;  %v1715_v16 = vpop.f32.mrb[1].mxu1 }
 0x170   : > { %v596_v17 = vpop.f32.mrb[2].mxu0  ;;  %v659_v19 = vpop.f32.mrb[2].mxu1 }
 0x171   : > { %v725_v18 = vpack.c.bf16 %v594_v12, %v594_v12  ;;  %v1708_v20 = vpop.f32.mrb[3].mxu0  ;;  %v733_v21 = vpack.c.bf16 %v657_v15, %v657_v15  ;;  %v1716_v22 = vpop.f32.mrb[3].mxu1 }
 0x173   : > { %727 = vrot.lane.b32.xlu1 %v725_v18, %s2159_s3  ;;  %735 = vrot.lane.b32.xlu0 %v733_v21, %s2159_s3  ;;  %v754_v23 = vsel %vm749_vm2, %v733_v21, 0 }
 0x174   : > { %1726 = vmatpush3.bf16.xpose.msra.mxu1 %v754_v23 }
 0x175   : > { %1737 = vmatprep.subr.bf16.mxu1 %v2157_v0 }
 0x177   : > { %739 = vrot.lane.b32.xlu1 %v733_v21, %s2160_s25  ;;  %737 = vrot.lane.b32.xlu0 %v733_v21, %s2161_s20  ;;  %v719_v24 = vpop.f32.mrb[4].mxu0 }
 0x178   : > { %v1723_v25 = vpop.f32.mrb[5].mxu0  ;;  %v720_v32 = vadd.f32 %v1631_v30, %v719_v24 }
 0x179   : > { %v722_v26 = vpop.f32.mrb[6].mxu0 }
 0x17a   : > { %v1724_v27 = vpop.f32.mrb[7].mxu0  ;;  %v2468_v36 = vpack.c.bf16 %v720_v32, %v720_v32 }
 0x17b   : > { %731 = vrot.lane.b32.xlu1 %v725_v18, %s2160_s25  ;;  %729 = vrot.lane.b32.xlu0 %v725_v18, %s2161_s20 }
 0x17c   : > { %1728 = vmatmul.mubr.msk.bf16.vlgmr.msra.gmra.mrb[4].mxu1 %vm749_vm2, %v725_v18  ;;  %v995_v38 = vsel %vm993_vm3, %v2468_v36, 0 }
 0x17d   : > { %1739 = vmatprep.mubr.msk.bf16.mxu1 %vm2158_vm0, %v2157_v0 }
 0x1e5   : > { %v736_v28 = vpop.permute.xlu0 %735  ;;  %v728_v29 = vpop.permute.xlu1 %727 }
 0x1e6   : > { %v800_v31 = vsel %vm749_vm2, %v736_v28, 0 }
 0x1e7   : > { %1732 = vmatpush3.bf16.xpose.msra.mxu0 %v800_v31 }
 0x1e8   : > { %1743 = vmatprep.subr.bf16.mxu0 %v2157_v0 }
 0x1e9   : > { %v738_v33 = vpop.permute.xlu0 %737  ;;  %v740_v35 = vpop.permute.xlu1 %739 }
 0x1ea   : > { %v846_v34 = vsel %vm749_vm2, %v738_v33, 0  ;;  %v892_v37 = vsel %vm749_vm2, %v740_v35, 0 }
 0x1eb   : > { %1738 = vmatpush3.bf16.xpose.msra.mxu1 %v846_v34 }
 0x1ec   : > { %1749 = vmatprep.subr.bf16.mxu1 %v2157_v0 }
 0x1ed   : > { %v730_v39 = vpop.permute.xlu0 %729  ;;  %v732_v40 = vpop.permute.xlu1 %731 }
 0x1ee   : > { %1734 = vmatmul.mubr.msk.bf16.vlgmr.msra.gmra.mrb[8].mxu0 %vm749_vm2, %v728_v29 }
 0x1ef   : > { %1744 = vmatpush3.bf16.xpose.msra.mxu0 %v892_v37  ;;  %1745 = vmatprep.mubr.msk.bf16.mxu0 %vm2158_vm0, %v2157_v0 }
 0x1f0   : > { %1755 = vmatprep.subr.bf16.mxu0 %v2157_v0 }
 0x1f2   : > { %1740 = vmatmul.mubr.msk.bf16.vlgmr.msra.gmra.mrb[8].mxu1 %vm749_vm2, %v730_v39 }
 0x1f3   : > { %1750 = vmatpush3.bf16.msra.mxu1 %v995_v38  ;;  %1751 = vmatprep.mubr.msk.bf16.mxu1 %vm2158_vm0, %v2157_v0 }
 0x1f4   : > { %1761 = vmatprep.subr.bf16.mxu1 %v2157_v0 }
 0x1f6   : > { %1746 = vmatmul.mubr.msk.bf16.vlgmr.msra.gmra.mrb[12].mxu0 %vm749_vm2, %v732_v40 }
 0x1f7   : > { %1757 = vmatprep.mubr.msk.bf16.mxu0 %vm2158_vm0, %v2157_v0 }
 0x24f   : > { %v790_v41 = vpop.f32.mrb[4].mxu1 }
 0x250   : > { %v1729_v42 = vpop.f32.mrb[5].mxu1  ;;  %v934_v43 = vsel %vm749_vm2, %v790_v41, -inf }
 0x251   : > { %935 = vmax.xlane.f32.xlu0 %v934_v43  ;;  %v793_v44 = vpop.f32.mrb[6].mxu1 }
 0x252   : > { %v1730_v45 = vpop.f32.mrb[7].mxu1 }
 0x253   : > { %v1903_v45 = vld [vmem:[#allocation7] sm:$0xff]  }
 0x2c1   : > { %v836_v46 = vpop.f32.mrb[8].mxu0 }
 0x2c2   : > { %v1735_v47 = vpop.f32.mrb[9].mxu0  ;;  %v937_v48 = vsel %vm749_vm2, %v836_v46, -inf }
 0x2c3   : > { %938 = vmax.xlane.f32.xlu1 %v937_v48  ;;  %v839_v49 = vpop.f32.mrb[10].mxu0 }
 0x2c4   : > { %v1736_v50 = vpop.f32.mrb[11].mxu0 }
 0x2c5   : > { %v882_v51 = vpop.f32.mrb[8].mxu1 }
 0x2c6   : > { %v1741_v52 = vpop.f32.mrb[9].mxu1  ;;  %v940_v53 = vsel %vm749_vm2, %v882_v51, -inf }
 0x2c7   : > { %941 = vmax.xlane.f32.xlu0 %v940_v53  ;;  %v885_v54 = vpop.f32.mrb[10].mxu1 }
 0x2c8   : > { %v1742_v55 = vpop.f32.mrb[11].mxu1 }
 0x2c9   : > { %v928_v56 = vpop.f32.mrb[12].mxu0 }
 0x2ca   : > { %v1747_v57 = vpop.f32.mrb[13].mxu0  ;;  %v943_v58 = vsel %vm749_vm2, %v928_v56, -inf }
 0x2cb   : > { %944 = vmax.xlane.f32.xlu0 %v943_v58  ;;  %v931_v59 = vpop.f32.mrb[14].mxu0 }
 0x2cc   : > { %v1748_v60 = vpop.f32.mrb[15].mxu0 }
 0x2d4   : > { %743 = vrot.lane.b32.xlu1 %v2468_v36, %s2159_s3  ;;  %s1447_s3 = scalar_lea.sflag [#allocation12], %s2502_s28 }
 0x2de   : > { %v936_v61 = vpop.xlane.xlu0 %935 }
 0x2df   : > { %v946_v62 = vsub.f32 %v790_v41, %v936_v61 }
 0x2e1   : > { %v950_v63 = vmul.f32 1.442695, %v946_v62 }
 0x2e3   : > { %1911 = vpow2.f32 %v950_v63 }
 0x2ed   : > { %v1912_v1 = vpop.eup %1911 }
 0x2ee   : > { %v958_v2 = vsel %vm749_vm2, %v1912_v1, 0.0 }
 0x2f8   : > { %959 = vadd.xlane.f32.xlu1 %v958_v2 }
 0x350   : > { %v939_v3 = vpop.xlane.xlu1 %938 }
 0x351   : > { %v947_v4 = vsub.f32 %v836_v46, %v939_v3  ;;  %v1904_v46 = vld [vmem:[#allocation7 + $0x8] sm:$0xff]   ;;  %v1643_v3 = vld [vmem:[#allocation8] ss:$0 sm:$0xff] }
 0x353   : > { %v952_v6 = vmul.f32 1.442695, %v947_v4 }
 0x354   : > { %v942_v7 = vpop.xlane.xlu0 %941  ;;  %v744_v8 = vpop.permute.xlu1 %743 }
 0x355   : > { %1913 = vpow2.f32 %v952_v6  ;;  %v948_v9 = vsub.f32 %v882_v51, %v942_v7  ;;  %v1041_v10 = vsel %vm993_vm3, %v744_v8, 0 }
 0x356   : > { %1756 = vmatpush3.bf16.msra.mxu0 %v1041_v10 }
 0x357   : > { %v954_v11 = vmul.f32 1.442695, %v948_v9  ;;  %1767 = vmatprep.subr.bf16.mxu0 %v2157_v0 }
 0x358   : > { %v945_v12 = vpop.xlane.xlu0 %944 }
 0x359   : > { %1915 = vpow2.f32 %v954_v11  ;;  %v949_v13 = vsub.f32 %v928_v56, %v945_v12 }
 0x35b   : > { %v956_v14 = vmul.f32 1.442695, %v949_v13 }
 0x35d   : > { %1917 = vpow2.f32 %v956_v14 }
 0x35f   : > { %v1914_v15 = vpop.eup %1913 }
 0x360   : > { %v961_v16 = vsel %vm749_vm2, %v1914_v15, 0.0 }
 0x361   : > { %962 = vadd.xlane.f32.xlu0 %v961_v16 }
 0x363   : > { %v1916_v17 = vpop.eup %1915 }
 0x364   : > { %v964_v18 = vsel %vm749_vm2, %v1916_v17, 0.0 }
 0x365   : > { %965 = vadd.xlane.f32.xlu1 %v964_v18  ;;  %v1907_v18 = vld [vmem:[%s2666_s11] sm:$0xff]  }
 0x367   : > { %v1918_v19 = vpop.eup %1917 }
 0x368   : > { %v967_v20 = vsel %vm749_vm2, %v1918_v19, 0.0 }
 0x369   : > { %968 = vadd.xlane.f32.xlu0 %v967_v20 }
 0x376   : > { %747 = vrot.lane.b32.xlu1 %v2468_v36, %s2160_s25  ;;  %s2043_s25 = scalar_lea.vmem %s2574_s27, 512 }
 0x377   : > { %p2044_p2 = scmp.ne.s32.totalorder %s2574_s27, %s2043_s25 }
 0x379   : > { %p2045_p4 = pnand %p2044_p2, %p2706_p3 }
 0x37b   : > { %p2046_p7 = pneg %p2045_p4 }
 0x37f   : > { %745 = vrot.lane.b32.xlu0 %v2468_v36, %s2161_s20  ;;  %s2165_s20 = smov [#allocation11]  }
 0x380   : > { %s2047_s24 = sshll.u32 %s2165_s20, 4  ;;  %s2048_s24 = int_to_ptr.vmem [resolvable:$false] %s2047_s24 }
 0x381   : > { %p2050_p8 = scmp.lt.s32.totalorder %s2574_s27, %s2048_s24 }
 0x385   : > { %v960_v21 = vpop.xlane.xlu1 %959 }
 0x386   : > { %1919 = vrcp.f32 %v960_v21 }
 0x390   : > { %v1920_v22 = vpop.eup %1919 }
 0x391   : > { %v978_v23 = vmul.f32 %v1920_v22, %v1912_v1 }
 0x393   : > { %v986_v24 = vpack.c.bf16 %v978_v23, %v978_v23  ;;  %982 = vst.msk [vmem:[%s2505_s6] sm:$0xff] %vm749_vm2, %v978_v23 }
 0x395   : > { %1752 = vmatmul.mubr.msk.bf16.vlgmr.msra.gmra.mrb[12].mxu1 %vm749_vm2, %v986_v24 }
 0x396   : > { %1763 = vmatprep.mubr.msk.bf16.mxu1 %vm2158_vm0, %v2157_v0 }
 0x3ee   : > { %v963_v25 = vpop.xlane.xlu0 %962 }
 0x3ef   : > { %1921 = vrcp.f32 %v963_v25 }
 0x3f2   : > { %v966_v26 = vpop.xlane.xlu1 %965 }
 0x3f3   : > { %1923 = vrcp.f32 %v966_v26  ;;  %v1909_v26 = vld [vmem:[%s2666_s11 + $0x10] sm:$0xff]  }
 0x3f6   : > { %v969_v27 = vpop.xlane.xlu0 %968  ;;  %v748_v31 = vpop.permute.xlu1 %747 }
 0x3f7   : > { %1925 = vrcp.f32 %v969_v27  ;;  %v1133_v36 = vsel %vm993_vm3, %v748_v31, 0  ;;  %v1910_v27 = vld [vmem:[%s2666_s11 + $0x18] sm:$0xff]  }
 0x3f9   : > { %v1922_v28 = vpop.eup %1921 }
 0x3fa   : > { %v979_v29 = vmul.f32 %v1922_v28, %v1914_v15  ;;  %v746_v30 = vpop.permute.xlu0 %745  ;;  %v1647_v28 = vld [vmem:[%s2665_s10] ss:$0 sm:$0xff] }
 0x3fb   : > { %v1087_v32 = vsel %vm993_vm3, %v746_v30, 0 }
 0x3fc   : > { %1762 = vmatpush3.bf16.msra.mxu1 %v1087_v32  ;;  %v987_v33 = vpack.c.bf16 %v979_v29, %v979_v29  ;;  %983 = vst.msk [vmem:[%s2505_s6 + $0x8] sm:$0xff] %vm749_vm2, %v979_v29 }
 0x3fd   : > { %v1924_v34 = vpop.eup %1923  ;;  %1773 = vmatprep.subr.bf16.mxu1 %v2157_v0 }
 0x3fe   : > { %v980_v35 = vmul.f32 %v1924_v34, %v1916_v17  ;;  %1758 = vmatmul.mubr.msk.bf16.vlgmr.msra.gmra.mrb[16].mxu0 %vm749_vm2, %v987_v33  ;;  %v1905_v17 = vld [vmem:[%s2664_s9] sm:$0xff]  }
 0x3ff   : > { %1768 = vmatpush3.bf16.msra.mxu0 %v1133_v36  ;;  %1769 = vmatprep.mubr.msk.bf16.mxu0 %vm2158_vm0, %v2157_v0 }
 0x400   : > { %v988_v37 = vpack.c.bf16 %v980_v35, %v980_v35  ;;  %1781 = vmatprep.subr.bf16.mxu0 %v2157_v0  ;;  %984 = vst.msk [vmem:[%s2505_s6 + $0x10] sm:$0xff] %vm749_vm2, %v980_v35 }
 0x401   : > { %v1926_v38 = vpop.eup %1925 }
 0x402   : > { %v981_v39 = vmul.f32 %v1926_v38, %v1918_v19  ;;  %1764 = vmatmul.mubr.msk.bf16.vlgmr.msra.gmra.mrb[16].mxu1 %vm749_vm2, %v988_v37  ;;  %v1908_v19 = vld [vmem:[%s2666_s11 + $0x8] sm:$0xff]  }
 0x403   : > { %1777 = vmatprep.mubr.msk.bf16.mxu1 %vm2158_vm0, %v2157_v0  ;;  %1774 = vmatpush3.bf16.msra.mxu1 %v1903_v45 }
 0x404   : > { %v989_v40 = vpack.c.bf16 %v981_v39, %v981_v39  ;;  %985 = vst.msk [vmem:[%s2505_s6 + $0x18] sm:$0xff] %vm749_vm2, %v981_v39  ;;  %1775 = vmatprep.subr.bf16.mxu1 %v2157_v0  ;;  %s2049_s6 = scalar_lea.vmem %s2048_s24, 1024 }
 0x405   : > { %p2051_p11 = scmp.lt.s32.totalorder %s2049_s6, %s2043_s25 }
 0x406   : > { %1770 = vmatmul.mubr.msk.bf16.vlgmr.msra.gmra.mrb[20].mxu0 %vm749_vm2, %v989_v40 }
 0x407   : > { %1785 = vmatprep.mubr.msk.bf16.mxu0 %vm2158_vm0, %v2157_v0  ;;  %1776 = vmatpush3.bf16.msra.mxu1 %v1904_v46  ;;  %p2052_p13 = por %p2051_p11, %p2050_p8 }
 0x408   : > { %1789 = vmatprep.subr.bf16.mxu1 %v2157_v0  ;;  %1782 = vmatpush3.bf16.msra.mxu0 %v1905_v17 }
 0x409   : > { %1783 = vmatprep.subr.bf16.mxu0 %v2157_v0  ;;  %p2053_p1 = pnand %p2052_p13, %p2046_p7 }
 0x468   : > { %v1031_v41 = vpop.f32.mrb[12].mxu1 }
 0x469   : > { %v1753_v42 = vpop.f32.mrb[13].mxu1 }
 0x46a   : > { %v1034_v43 = vpop.f32.mrb[14].mxu1 }
 0x46b   : > { %v1754_v44 = vpop.f32.mrb[15].mxu1 }
 0x4d1   : > { %v1077_v47 = vpop.f32.mrb[16].mxu0 }
 0x4d2   : > { %1176 = vrot.lane.b32.xlu1 %v1077_v47, %s2162_s16  ;;  %v1759_v48 = vpop.f32.mrb[17].mxu0 }
 0x4d3   : > { %v1080_v49 = vpop.f32.mrb[18].mxu0 }
 0x4d4   : > { %v1760_v50 = vpop.f32.mrb[19].mxu0 }
 0x4d5   : > { %v1123_v51 = vpop.f32.mrb[16].mxu1 }
 0x4d6   : > { %1180 = vrot.lane.b32.xlu0 %v1123_v51, %s2163_s26  ;;  %v1765_v52 = vpop.f32.mrb[17].mxu1 }
 0x4d7   : > { %v1126_v53 = vpop.f32.mrb[18].mxu1 }
 0x4d8   : > { %v1766_v54 = vpop.f32.mrb[19].mxu1 }
 0x4d9   : > { %v1169_v55 = vpop.f32.mrb[20].mxu0 }
 0x4da   : > { %1184 = vrot.lane.b32.xlu1 %v1169_v55, %s2164_s21  ;;  %v1771_v56 = vpop.f32.mrb[21].mxu0 }
 0x4db   : > { %v1172_v57 = vpop.f32.mrb[22].mxu0 }
 0x4dc   : > { %v1772_v58 = vpop.f32.mrb[23].mxu0 }
 0x544   : > { %v1177_v59 = vpop.permute.xlu1 %1176 }
 0x545   : > { %v1187_v61 = vsel %vm749_vm2, %v1031_v41, %v1177_v59 }
 0x548   : > { %v1181_v60 = vpop.permute.xlu0 %1180 }
 0x549   : > { %v1189_v62 = vsel %vm1188_vm4, %v1187_v61, %v1181_v60 }
 0x54c   : > { %v1185_v63 = vpop.permute.xlu1 %1184 }
 0x54d   : > { %v1191_v1 = vsel %vm1190_vm5, %v1189_v62, %v1185_v63 }
 0x54e   : > { %v1192_v2 = vpack.c.bf16 %v1191_v1, %v1191_v1 }
 0x550   : > { %1778 = vmatmul.mubr.msk.bf16.vlgmr.msra.gmra.mrb[20].mxu1 %vm555_vm1, %v1192_v2 }
 0x551   : > { %1797 = vmatprep.mubr.msk.bf16.mxu1 %vm2158_vm0, %v2157_v0  ;;  %1790 = vmatpush3.bf16.msra.mxu1 %v1907_v18 }
 0x552   : > { %1791 = vmatprep.subr.bf16.mxu1 %v2157_v0 }
 0x555   : > { %1792 = vmatpush3.bf16.msra.mxu1 %v1908_v19 }
 0x556   : > { %1793 = vmatprep.subr.bf16.mxu1 %v2157_v0 }
 0x559   : > { %1794 = vmatpush3.bf16.msra.mxu1 %v1909_v26 }
 0x55a   : > { %1795 = vmatprep.subr.bf16.mxu1 %v2157_v0  ;;  %v1651_v0 = vld [vmem:[%s2667_s12] ss:$0 sm:$0xff] }
 0x55d   : > { %1796 = vmatpush3.bf16.msra.mxu1 %v1910_v27 }
 0x623   : > { %v1253_v4 = vpop.f32.mrb[20].mxu1 }
 0x624   : > { %v1254_v6 = vadd.f32 %v1643_v3, %v1253_v4  ;;  %v1779_v7 = vpop.f32.mrb[21].mxu1 }
 0x625   : > { %v1256_v8 = vpop.f32.mrb[22].mxu1 }
 0x626   : > { %v1780_v9 = vpop.f32.mrb[23].mxu1  ;;  %v1259_v10 = vadd.f32 %v1254_v6, %v2431_v5  ;;  %v1906_v5 = vld [vmem:[%s2664_s9 + $0x8] sm:$0xff]  }
 0x627   : > { %1784 = vmatpush3.bf16.msra.mxu0 %v1906_v5 }
 0x628   : > { %v1260_v11 = vsel %vm555_vm1, %v1259_v10, 0.0 }
 0x629   : > { %1261 = vadd.xlane.f32.xlu0 %v1260_v11 }
 0x6b6   : > { %v1262_v12 = vpop.xlane.xlu0 %1261 }
 0x6b7   : > { %v1264_v13 = vmul.f32 0.03125, %v1262_v12 }
 0x6b9   : > { %v1265_v14 = vsub.f32 %v1259_v10, %v1264_v13 }
 0x6bb   : > { %v1266_v15 = vmul.f32 %v1265_v14, %v1265_v14 }
 0x6bd   : > { %v1267_v16 = vsel %vm555_vm1, %v1266_v15, 0.0 }
 0x6be   : > { %1268 = vadd.xlane.f32.xlu1 %v1267_v16 }
 0x74b   : > { %v1269_v20 = vpop.xlane.xlu1 %1268 }
 0x74c   : > { %v1270_v21 = vmul.f32 0.03125, %v1269_v20 }
 0x74e   : > { %v1271_v22 = vadd.f32 1e-05, %v1270_v21 }
 0x750   : > { %1927 = vrsqrt.f32 %v1271_v22 }
 0x75a   : > { %v1928_v23 = vpop.eup %1927 }
 0x75b   : > { %v1273_v24 = vmul.f32 %v1928_v23, %v1265_v14 }
 0x75d   : > { %v1274_v25 = vpack.c.bf16 %v1273_v24, %v1273_v24 }
 0x75f   : > { %1786 = vmatmul.mubr.msk.bf16.vlgmr.msra.gmra.mrb[24].mxu0 %vm555_vm1, %v1274_v25 }
 0x832   : > { %v1335_v29 = vpop.f32.mrb[24].mxu0 }
 0x833   : > { %v1336_v30 = vadd.f32 %v1647_v28, %v1335_v29  ;;  %v1787_v31 = vpop.f32.mrb[25].mxu0 }
 0x834   : > { %v1338_v32 = vpop.f32.mrb[26].mxu0 }
 0x835   : > { %v1341_v33 = vmax.f32 %v1336_v30, 0.0  ;;  %v1788_v34 = vpop.f32.mrb[27].mxu0 }
 0x837   : > { %v1342_v35 = vpack.c.bf16 %v1341_v33, %v1341_v33 }
 0x839   : > { %1798 = vmatmul.mubr.msk.bf16.vlgmr.msra.gmra.mrb[24].mxu1 %vm1382_vm6, %v1342_v35 }
 0x90c   : > { %v1420_v36 = vpop.f32.mrb[24].mxu1 }
 0x90d   : > { %v1421_v37 = vadd.f32 %v1651_v0, %v1420_v36  ;;  %v1799_v38 = vpop.f32.mrb[25].mxu1 }
 0x90e   : > { %v1423_v39 = vpop.f32.mrb[26].mxu1 }
 0x90f   : > { %v1800_v40 = vpop.f32.mrb[27].mxu1  ;;  %v1426_v41 = vadd.f32 %v1421_v37, %v1273_v24 }
 0x911   : > { %v1427_v42 = vsel %vm555_vm1, %v1426_v41, 0.0 }
 0x912   : > { %1428 = vadd.xlane.f32.xlu0 %v1427_v42 }
 0x99f   : > { %v1429_v43 = vpop.xlane.xlu0 %1428 }
 0x9a0   : > { %v1430_v44 = vmul.f32 0.03125, %v1429_v43 }
 0x9a2   : > { %v1431_v45 = vsub.f32 %v1426_v41, %v1430_v44 }
 0x9a4   : > { %v1432_v46 = vmul.f32 %v1431_v45, %v1431_v45 }
 0x9a6   : > { %v1433_v47 = vsel %vm555_vm1, %v1432_v46, 0.0 }
 0x9a7   : > { %1434 = vadd.xlane.f32.xlu0 %v1433_v47 }
 0x9a8   : > { %2056 = shalt.err (!%p2053_p1)
}
 0x9a9   : > { %s2057_s26 = scalar_lea.hbm %s2579_s18, 512  ;;  %s2061_s29 = scalar_lea.hbm %s2705_s14, 1024 }
 0x9aa   : > { %p2058_p0 = scmp.ne.s32.totalorder %s2579_s18, %s2057_s26  ;;  %p2062_p9 = scmp.lt.u32.totalorder %s2579_s18, %s2705_s14 }
 0x9ab   : > { %p2063_p12 = scmp.lt.u32.totalorder %s2061_s29, %s2057_s26  ;;  %p2065_p2 = scmp.lt.u32.totalorder %s2057_s26, %s2579_s18 }
 0x9ac   : > { %p2059_p6 = pnand %p2058_p0, %p2706_p3 }
 0x9ad   : > { %p2064_p10 = por %p2063_p12, %p2062_p9 }
 0x9ae   : > { %p2060_p5 = pneg %p2059_p6 }
 0x9af   : > { %p2066_p4 = por %p2065_p2, %p2064_p10 }
 0x9b1   : > { %p2067_p7 = pnand %p2066_p4, %p2060_p5 }
 0x9b3   : > { %2070 = shalt.err (!%p2067_p7)
}
 0x9b4   : > { %s2166_s13 = smov 128   ;;  %s1620_s25 = sshll.u32 %s2502_s28, 3 }
 0x9b5   : > { %1818 = dma.vmem_to_hbm [thread:$0]  (%p2706_p3), %s2574_s27, 512, %s2579_s18, %s1447_s3, %s2166_s13, %s2166_s13, %s2162_s16  }
 0x9b6   : > { %s1659_s20 = sshll.u32 %s2264_s17, 7  ;;  %s517_s24 = scalar_lea.vmem [#allocation10], %s1620_s25 }
 0x9b7   : > { %s1460_s6 = sshll.u32 %s517_s24, 4  ;;  %s2707_s15 = sld [smem:[#allocation26_spill]]  ;;  %s2613_s6 = int_to_ptr.vmem [resolvable:$true] %s1460_s6 }
 0x9b8   : > { %s1442_s16 = scalar_lea.sflag [#allocation4], %s2502_s28  ;;  %s2071_s27 = scalar_lea.vmem %s2613_s6, 128 }
 0x9b9   : > { %p2072_p8 = scmp.ne.s32.totalorder %s2613_s6, %s2071_s27  ;;  %s2167_s17 = smov [#allocation10]  }
 0x9ba   : > { %s2075_s18 = sshll.u32 %s2167_s17, 4  ;;  %s2076_s18 = int_to_ptr.vmem [resolvable:$false] %s2075_s18 }
 0x9bb   : > { %p2073_p11 = pnand %p2072_p8, %p2706_p3  ;;  %s2077_s3 = scalar_lea.vmem %s2076_s18, 256 }
 0x9bc   : > { %p2078_p1 = scmp.lt.s32.totalorder %s2613_s6, %s2076_s18  ;;  %p2079_p0 = scmp.lt.s32.totalorder %s2077_s3, %s2071_s27 }
 0x9bd   : > { %s2708_s19 = smov %s2707_s15  ;;  %s2611_s29 = scalar_lea.hbm %s2707_s15, %s1659_s20 }
 0x9be   : > { %p2074_p13 = pneg %p2073_p11  ;;  %p2080_p6 = por %p2079_p0, %p2078_p1 }
 0x9c0   : > { %p2081_p5 = pnand %p2080_p6, %p2074_p13 }
 0xa34   : > { %v1435_v48 = vpop.xlane.xlu0 %1434 }
 0xa35   : > { %v1436_v49 = vmul.f32 0.03125, %v1435_v48 }
 0xa37   : > { %v1437_v50 = vadd.f32 1e-05, %v1436_v49 }
 0xa39   : > { %1929 = vrsqrt.f32 %v1437_v50 }
 0xa43   : > { %v1930_v51 = vpop.eup %1929 }
 0xa44   : > { %v1439_v52 = vmul.f32 %v1930_v51, %v1431_v45 }
 0xa46   : > { %1440 = vst.msk [vmem:[%s517_s24] sm:$0xff] %vm555_vm1, %v1439_v52 }
 0xa47   : > { %2084 = shalt.err (!%p2081_p5)
}
 0xa48   : > { %s2085_s28 = scalar_lea.hbm %s2611_s29, 128  ;;  %s2089_s25 = scalar_lea.hbm %s2708_s19, 256 }
 0xa49   : > { %p2086_p9 = scmp.ne.s32.totalorder %s2611_s29, %s2085_s28  ;;  %p2090_p2 = scmp.lt.u32.totalorder %s2611_s29, %s2708_s19 }
 0xa4a   : > { %p2091_p4 = scmp.lt.u32.totalorder %s2089_s25, %s2085_s28  ;;  %p2093_p8 = scmp.lt.u32.totalorder %s2085_s28, %s2611_s29 }
 0xa4b   : > { %p2087_p12 = pnand %p2086_p9, %p2706_p3 }
 0xa4c   : > { %p2092_p7 = por %p2091_p4, %p2090_p2 }
 0xa4d   : > { %p2088_p10 = pneg %p2087_p12 }
 0xa4e   : > { %p2094_p11 = por %p2093_p8, %p2092_p7 }
 0xa50   : > { %p2095_p13 = pnand %p2094_p11, %p2088_p10 }
 0xa52   : > { %2098 = shalt.err (!%p2095_p13)
}
 0xa53   : > { %1817 = dma.vmem_to_hbm [thread:$0]  (%p2706_p3), %s2613_s6, 128, %s2611_s29, %s1442_s16  }
 0xa54 PF: > { %s2709_s26 = sld [smem:[#allocation20_spill]]  ;;  %s2710_s21 = sld [smem:[#allocation18_spill]] }
 0xa55   : > { %s2711_s15 = sld [smem:[#allocation23_spill]] }
 0xa5a   : > { %p1849_p1 = scmp.ge.s32.totalorder %s2709_s26, 2  ;;  %s1488_s27 = sand.u32 1, %s2710_s21  }
 0xa5b   : > { %p2712_p0 = scmp.ne.s32.totalorder %s2711_s15, 0  ;;  %s1489_s17 = scalar_lea.sflag [#allocation4], %s1488_s27 }
 0xa5d   : > { %p1835_p6 = pnand %p1849_p1, %p2712_p0 }
 0xa5f   : > { %2128 = dma.done.wait (!%p1835_p6), %s1489_s17, 128  }
 0xa60   : > { %2130 = vsyncadd (!%p1835_p6), %s1489_s17, 4294967168  ;;  %s1498_s18 = scalar_lea.sflag [#allocation12], %s1488_s27 }
 0xa61   : > { %2132 = dma.done.wait (!%p1835_p6), %s1498_s18, 512  }
 0xa62   : > { %2134 = vsyncadd (!%p1835_p6), %s1498_s18, 4294966784  ;;  %s2713_s16 = sld [smem:[#allocation21_spill]]  ;;  %s2714_s23 = sld [smem:[#allocation19_spill]] }
 0xa63   : > { %s2715_s15 = sld [smem:[#allocation22_spill]]  ;;  %s2716_s29 = smov %s2141_s30 }
 0xa68   : > { %p31_p3 = scmp.ge.s32.totalorder %s2713_s16, 4   ;;  %s2717_s30 = smov %s2714_s23 }
 0xa6a   :  { %33 = sbr.rel (!%p31_p3) target bundleno = 13 (0xd), region = 141 }
 0xa71   :  { %1503 = vsyncpa [#allocation3], 1 }
 0xa72   :  { %1505 = vsyncpa [#allocation3 + $0x1], 1 }
 0xa73   :  { %1506 = vsyncpa [#allocation6], 1 }
 0xa74   :  { %1507 = vsyncpa [#allocation9], 1 }
 0xa75   :  { %1508 = vsyncpa [#allocation4], 1 }
 0xa76   :  { %1510 = vsyncpa [#allocation4 + $0x1], 1 }
 0xa77   :  { %1511 = vsyncpa [#allocation12], 1 }
 0xa78   :  { %1513 = vsyncpa [#allocation12 + $0x1], 1 }

</bundles_post_ra>
